<compile_context>
chip_gen: v6e
topology: v6e:2x2x1
jax: 0.10.0
libtpu: 0.0.40
codegen_flags: <defaults>
</compile_context>

<pallas_src>
import jax
import jax.numpy as jnp
import numpy as np
from jax.experimental import pallas as pl
from jax.experimental.pallas import tpu as pltpu

INPUT_DIM = 6 + 7 * 6  # = 48, hardcoded in the PyTorch module
LN_EPS = 1e-5


def _round_up(x, m):
    return (x + m - 1) // m * m


def _layernorm(h, gamma, beta):
    mu = jnp.mean(h, axis=-1, keepdims=True)
    var = jnp.mean((h - mu) ** 2, axis=-1, keepdims=True)
    return (h - mu) * jax.lax.rsqrt(var + LN_EPS) * gamma + beta


def policy_kernel(
    x_ref,
    w1_ref, b1_ref, g1_ref, be1_ref,
    w2_ref, b2_ref, g2_ref, be2_ref,
    wh_ref, bh_ref,
    mean_ref, logstd_ref,
):
    action_dim = mean_ref.shape[-1]
    x = x_ref[...]

    # Linear(input_dim, hidden) -> LayerNorm -> ReLU
    h = jnp.dot(x, w1_ref[...], preferred_element_type=jnp.float32) + b1_ref[...]
    h = jnp.maximum(_layernorm(h, g1_ref[...], be1_ref[...]), 0.0)

    # Linear(hidden, hidden) -> LayerNorm -> ReLU
    h = jnp.dot(h, w2_ref[...], preferred_element_type=jnp.float32) + b2_ref[...]
    h = jnp.maximum(_layernorm(h, g2_ref[...], be2_ref[...]), 0.0)

    # Fused mean|log_std head: one (hidden, 2*action_dim) matmul; only the real
    # columns are written to HBM (two compact outputs, no padded slab).
    head = jnp.dot(h, wh_ref[...], preferred_element_type=jnp.float32) + bh_ref[...]
    mean_ref[...] = head[:, :action_dim].astype(mean_ref.dtype)
    logstd_ref[...] = jnp.clip(head[:, action_dim:], -20.0, 2.0).astype(logstd_ref.dtype)


def _const_spec(shape):
    # Constant index_map: same block every grid step -> no re-DMA.
    # Buffered(1): single-buffer the resident weights (halves their VMEM).
    try:
        return pl.BlockSpec(shape, lambda i: (0, 0), pipeline_mode=pl.Buffered(1))
    except TypeError:  # older jax without pipeline_mode kwarg
        return pl.BlockSpec(shape, lambda i: (0, 0))


def _dimension_semantics(num_steps):
    if num_steps < 2:
        return ("arbitrary",)
    try:
        kind = jax.devices()[0].device_kind.lower()
    except Exception:
        kind = ""
    # v7x has 2 TensorCores per chip; only CORE_PARALLEL shards a grid axis
    # across them.  Require >=4 steps so each core still pipelines >=2 tiles.
    if "7" in kind and hasattr(pltpu, "CORE_PARALLEL") and num_steps >= 4:
        return (pltpu.CORE_PARALLEL,)
    return ("parallel",)


def _pick_tile_and_vmem(batch, batch_tile, hidden, head_dim):
    """Pick the batch tile and (optionally) a vmem_limit_bytes override."""
    tile = max(8, _round_up(min(batch_tile, _round_up(batch, 8)), 8))

    def est(t):
        weights = (INPUT_DIM * hidden + hidden * hidden + hidden * head_dim
                   + 6 * hidden + head_dim) * 4           # single-buffered consts
        acts = (t * INPUT_DIM + t * head_dim) * 4 * 2      # x + outs, double-buffered
        return weights + acts

    budget = 48 * 1024 * 1024          # safe under v7x's 64 MiB physical VMEM
    while tile > 8 and est(tile) > budget:
        tile = max(8, _round_up(tile // 2, 8))

    vmem_limit = None
    if est(tile) > 14 * 1024 * 1024:   # above v5e's 16 MiB scoped default
        vmem_limit = int(min(est(tile) + (4 << 20), 56 * 1024 * 1024))
    return tile, vmem_limit


def policy_forward(state, params, *, batch_tile=1024):
    """state: (B, INPUT_DIM) float32.  Returns (mean, log_std), each (B, action_dim)."""
    B, in_dim = state.shape
    assert in_dim == INPUT_DIM
    hidden = params["w1"].shape[1]

    # Fused head weights, precomputed once in init_params (fallback: build here).
    if "wh" in params:
        wh, bh = params["wh"], params["bh"]
    else:
        wh = jnp.concatenate([params["wm"], params["ws"]], axis=1)
        bh = jnp.concatenate([params["bm"], params["bs"]], axis=1)
    head_dim = wh.shape[1]
    action_dim = head_dim // 2

    tile, vmem_limit = _pick_tile_and_vmem(B, batch_tile, hidden, head_dim)
    B_pad = _round_up(B, tile)
    x = state if B_pad == B else jnp.pad(state, ((0, B_pad - B), (0, 0)))
    num_steps = B_pad // tile

    in_specs = [
        pl.BlockSpec((tile, in_dim), lambda i: (i, 0)),                 # x
        _const_spec(params["w1"].shape), _const_spec(params["b1"].shape),
        _const_spec(params["g1"].shape), _const_spec(params["be1"].shape),
        _const_spec(params["w2"].shape), _const_spec(params["b2"].shape),
        _const_spec(params["g2"].shape), _const_spec(params["be2"].shape),
        _const_spec(wh.shape), _const_spec(bh.shape),
    ]
    out_specs = [
        pl.BlockSpec((tile, action_dim), lambda i: (i, 0)),             # mean
        pl.BlockSpec((tile, action_dim), lambda i: (i, 0)),             # log_std
    ]
    out_shape = (
        jax.ShapeDtypeStruct((B_pad, action_dim), jnp.float32),
        jax.ShapeDtypeStruct((B_pad, action_dim), jnp.float32),
    )

    mean, log_std = pl.pallas_call(
        policy_kernel,
        grid_spec=pltpu.PrefetchScalarGridSpec(
            num_scalar_prefetch=0,
            grid=(num_steps,),
            in_specs=in_specs,
            out_specs=out_specs,
        ),
        out_shape=out_shape,
        compiler_params=pltpu.CompilerParams(
            dimension_semantics=_dimension_semantics(num_steps),
            vmem_limit_bytes=vmem_limit,
        ),
    )(
        x,
        params["w1"], params["b1"], params["g1"], params["be1"],
        params["w2"], params["b2"], params["g2"], params["be2"],
        wh, bh,
    )
    return mean[:B], log_std[:B]


def orthogonal_init(key, in_dim, out_dim, gain):
    """Deterministic orthogonal init matching nn.init.orthogonal_ semantics.

    PyTorch stores Linear weight as (out, in); we return the (in, out)
    transpose so the kernel can compute x @ W.
    """
    a = jax.random.normal(key, (out_dim, in_dim), dtype=jnp.float32)
    transpose = out_dim < in_dim
    if transpose:
        a = a.T
    q, r = jnp.linalg.qr(a)
    d = jnp.diag(r)
    q = q * jnp.where(d >= 0, 1.0, -1.0)      # sign fix: never multiply by 0
    if transpose:
        q = q.T
    w_torch = gain * q                         # (out, in)
    return w_torch.T                           # (in, out)


def init_params(key, hidden_dim, action_dim):
    k1, k2, k3, k4 = jax.random.split(key, 4)
    sqrt2 = float(np.sqrt(2.0))
    p = {
        "w1": orthogonal_init(k1, INPUT_DIM, hidden_dim, sqrt2),
        "b1": jnp.zeros((1, hidden_dim), jnp.float32),
        "g1": jnp.ones((1, hidden_dim), jnp.float32),
        "be1": jnp.zeros((1, hidden_dim), jnp.float32),
        "w2": orthogonal_init(k2, hidden_dim, hidden_dim, sqrt2),
        "b2": jnp.zeros((1, hidden_dim), jnp.float32),
        "g2": jnp.ones((1, hidden_dim), jnp.float32),
        "be2": jnp.zeros((1, hidden_dim), jnp.float32),
        "wm": orthogonal_init(k3, hidden_dim, action_dim, 0.01),
        "bm": jnp.zeros((1, action_dim), jnp.float32),
        "ws": orthogonal_init(k4, hidden_dim, action_dim, 0.01),
        "bs": jnp.zeros((1, action_dim), jnp.float32),
    }
    # Precompute the fused mean|log_std head once (removes per-forward concat
    # ops and an extra HBM round-trip of the head weights).
    p["wh"] = jnp.concatenate([p["wm"], p["ws"]], axis=1)
    p["bh"] = jnp.concatenate([p["bm"], p["bs"]], axis=1)
    return p


def reference_forward(state, params):
    """Pure-JAX reference of the PyTorch forward for verification."""
    def ln(h, g, b):
        mu = jnp.mean(h, axis=-1, keepdims=True)
        var = jnp.mean((h - mu) ** 2, axis=-1, keepdims=True)
        return (h - mu) / jnp.sqrt(var + LN_EPS) * g + b

    h = state @ params["w1"] + params["b1"]
    h = jnp.maximum(ln(h, params["g1"], params["be1"]), 0.0)
    h = h @ params["w2"] + params["b2"]
    h = jnp.maximum(ln(h, params["g2"], params["be2"]), 0.0)
    mean = h @ params["wm"] + params["bm"]
    log_std = jnp.clip(h @ params["ws"] + params["bs"], -20.0, 2.0)
    return mean, log_std


if __name__ == "__main__":
    key = jax.random.PRNGKey(0)
    k_param, k_state = jax.random.split(key)

    hidden_dim = 32
    action_dim = 4
    batch = 64  # wrapper handles any B (pads to tile multiple)

    params = init_params(k_param, hidden_dim, action_dim)
    state = jax.random.normal(k_state, (batch, INPUT_DIM), dtype=jnp.float32)

    mean, log_std = policy_forward(state, params, batch_tile=1024)
    jax.block_until_ready(mean)
    jax.block_until_ready(log_std)

    # correctness check against pure-JAX reference
    ref_mean, ref_log_std = reference_forward(state, params)
    np.testing.assert_allclose(np.asarray(mean), np.asarray(ref_mean),
                               rtol=1e-5, atol=1e-5)
    np.testing.assert_allclose(np.asarray(log_std), np.asarray(ref_log_std),
                               rtol=1e-5, atol=1e-5)

    print("KERNEL_OK")
</pallas_src>

<mosaic_0001>
module attributes {stable_mosaic.version = 11 : i64} {
  func.func @policy_kernel(%arg0: i32, %arg1: memref<64x48xf32, #tpu.memory_space<vmem>>, %arg2: memref<48x32xf32, #tpu.memory_space<vmem>>, %arg3: memref<1x32xf32, #tpu.memory_space<vmem>>, %arg4: memref<1x32xf32, #tpu.memory_space<vmem>>, %arg5: memref<1x32xf32, #tpu.memory_space<vmem>>, %arg6: memref<32x32xf32, #tpu.memory_space<vmem>>, %arg7: memref<1x32xf32, #tpu.memory_space<vmem>>, %arg8: memref<1x32xf32, #tpu.memory_space<vmem>>, %arg9: memref<1x32xf32, #tpu.memory_space<vmem>>, %arg10: memref<32x8xf32, #tpu.memory_space<vmem>>, %arg11: memref<1x8xf32, #tpu.memory_space<vmem>>, %arg12: memref<64x4xf32, #tpu.memory_space<vmem>>, %arg13: memref<64x4xf32, #tpu.memory_space<vmem>>) attributes {dimension_semantics = [#tpu.dimension_semantics<arbitrary>], iteration_bounds = array<i64: 1>, scalar_prefetch = 0 : i64, scratch_operands = 0 : i64, tpu.core_type = #tpu.core_type<tc>, window_params = [{transform_indices = @transform_0, window_bounds = array<i64: 64, 48>}, {pipeline_mode = #tpu.pipeline_mode<synchronous>, transform_indices = @transform_1, window_bounds = array<i64: 48, 32>}, {pipeline_mode = #tpu.pipeline_mode<synchronous>, transform_indices = @transform_2, window_bounds = array<i64: 1, 32>}, {pipeline_mode = #tpu.pipeline_mode<synchronous>, transform_indices = @transform_3, window_bounds = array<i64: 1, 32>}, {pipeline_mode = #tpu.pipeline_mode<synchronous>, transform_indices = @transform_4, window_bounds = array<i64: 1, 32>}, {pipeline_mode = #tpu.pipeline_mode<synchronous>, transform_indices = @transform_5, window_bounds = array<i64: 32, 32>}, {pipeline_mode = #tpu.pipeline_mode<synchronous>, transform_indices = @transform_6, window_bounds = array<i64: 1, 32>}, {pipeline_mode = #tpu.pipeline_mode<synchronous>, transform_indices = @transform_7, window_bounds = array<i64: 1, 32>}, {pipeline_mode = #tpu.pipeline_mode<synchronous>, transform_indices = @transform_8, window_bounds = array<i64: 1, 32>}, {pipeline_mode = #tpu.pipeline_mode<synchronous>, transform_indices = @transform_9, window_bounds = array<i64: 32, 8>}, {pipeline_mode = #tpu.pipeline_mode<synchronous>, transform_indices = @transform_10, window_bounds = array<i64: 1, 8>}, {transform_indices = @transform_11, window_bounds = array<i64: 64, 4>}, {transform_indices = @transform_12, window_bounds = array<i64: 64, 4>}]} {
    %c0 = arith.constant 0 : index
    %c0_0 = arith.constant 0 : index
    %0 = vector.load %arg1[%c0, %c0_0] : memref<64x48xf32, #tpu.memory_space<vmem>>, vector<64x48xf32>
    %c0_1 = arith.constant 0 : index
    %c0_2 = arith.constant 0 : index
    %1 = vector.load %arg2[%c0_1, %c0_2] : memref<48x32xf32, #tpu.memory_space<vmem>>, vector<48x32xf32>
    %cst = arith.constant dense<0.000000e+00> : vector<64x32xf32>
    %2 = tpu.matmul %0, %1, %cst {dimension_numbers = #tpu.dot_dimension_numbers<[1], [0], [0], [1], [0, 0, 1, 1], [], []>} : vector<64x48xf32>, vector<48x32xf32>, vector<64x32xf32> -> vector<64x32xf32>
    %c0_3 = arith.constant 0 : index
    %c0_4 = arith.constant 0 : index
    %3 = vector.load %arg3[%c0_3, %c0_4] : memref<1x32xf32, #tpu.memory_space<vmem>>, vector<1x32xf32>
    %4 = vector.broadcast %3 : vector<1x32xf32> to vector<64x32xf32>
    %5 = arith.addf %2, %4 : vector<64x32xf32>
    %c0_5 = arith.constant 0 : index
    %c0_6 = arith.constant 0 : index
    %6 = vector.load %arg4[%c0_5, %c0_6] : memref<1x32xf32, #tpu.memory_space<vmem>>, vector<1x32xf32>
    %c0_7 = arith.constant 0 : index
    %c0_8 = arith.constant 0 : index
    %7 = vector.load %arg5[%c0_7, %c0_8] : memref<1x32xf32, #tpu.memory_space<vmem>>, vector<1x32xf32>
    %cst_9 = arith.constant dense<0.000000e+00> : vector<64xf32>
    %8 = vector.multi_reduction <add>, %5, %cst_9 [1] : vector<64x32xf32> to vector<64xf32>
    %9 = vector.shape_cast %8 : vector<64xf32> to vector<64x1xf32>
    %cst_10 = arith.constant 3.200000e+01 : f32
    %10 = vector.broadcast %cst_10 : f32 to vector<64x1xf32>
    %11 = arith.divf %9, %10 : vector<64x1xf32>
    %12 = vector.broadcast %11 : vector<64x1xf32> to vector<64x32xf32>
    %13 = arith.subf %5, %12 : vector<64x32xf32>
    %14 = arith.mulf %13, %13 : vector<64x32xf32>
    %cst_11 = arith.constant dense<0.000000e+00> : vector<64xf32>
    %15 = vector.multi_reduction <add>, %14, %cst_11 [1] : vector<64x32xf32> to vector<64xf32>
    %16 = vector.shape_cast %15 : vector<64xf32> to vector<64x1xf32>
    %cst_12 = arith.constant 3.200000e+01 : f32
    %17 = vector.broadcast %cst_12 : f32 to vector<64x1xf32>
    %18 = arith.divf %16, %17 : vector<64x1xf32>
    %19 = vector.broadcast %11 : vector<64x1xf32> to vector<64x32xf32>
    %20 = arith.subf %5, %19 : vector<64x32xf32>
    %cst_13 = arith.constant 9.99999974E-6 : f32
    %21 = vector.broadcast %cst_13 : f32 to vector<64x1xf32>
    %22 = arith.addf %18, %21 : vector<64x1xf32>
    %23 = math.rsqrt %22 : vector<64x1xf32>
    %24 = vector.broadcast %23 : vector<64x1xf32> to vector<64x32xf32>
    %25 = arith.mulf %20, %24 : vector<64x32xf32>
    %26 = vector.broadcast %6 : vector<1x32xf32> to vector<64x32xf32>
    %27 = arith.mulf %25, %26 : vector<64x32xf32>
    %28 = vector.broadcast %7 : vector<1x32xf32> to vector<64x32xf32>
    %29 = arith.addf %27, %28 : vector<64x32xf32>
    %cst_14 = arith.constant 0.000000e+00 : f32
    %30 = vector.broadcast %cst_14 : f32 to vector<64x32xf32>
    %31 = arith.maximumf %29, %30 : vector<64x32xf32>
    %c0_15 = arith.constant 0 : index
    %c0_16 = arith.constant 0 : index
    %32 = vector.load %arg6[%c0_15, %c0_16] : memref<32x32xf32, #tpu.memory_space<vmem>>, vector<32x32xf32>
    %cst_17 = arith.constant dense<0.000000e+00> : vector<64x32xf32>
    %33 = tpu.matmul %31, %32, %cst_17 {dimension_numbers = #tpu.dot_dimension_numbers<[1], [0], [0], [1], [0, 0, 1, 1], [], []>} : vector<64x32xf32>, vector<32x32xf32>, vector<64x32xf32> -> vector<64x32xf32>
    %c0_18 = arith.constant 0 : index
    %c0_19 = arith.constant 0 : index
    %34 = vector.load %arg7[%c0_18, %c0_19] : memref<1x32xf32, #tpu.memory_space<vmem>>, vector<1x32xf32>
    %35 = vector.broadcast %34 : vector<1x32xf32> to vector<64x32xf32>
    %36 = arith.addf %33, %35 : vector<64x32xf32>
    %c0_20 = arith.constant 0 : index
    %c0_21 = arith.constant 0 : index
    %37 = vector.load %arg8[%c0_20, %c0_21] : memref<1x32xf32, #tpu.memory_space<vmem>>, vector<1x32xf32>
    %c0_22 = arith.constant 0 : index
    %c0_23 = arith.constant 0 : index
    %38 = vector.load %arg9[%c0_22, %c0_23] : memref<1x32xf32, #tpu.memory_space<vmem>>, vector<1x32xf32>
    %cst_24 = arith.constant dense<0.000000e+00> : vector<64xf32>
    %39 = vector.multi_reduction <add>, %36, %cst_24 [1] : vector<64x32xf32> to vector<64xf32>
    %40 = vector.shape_cast %39 : vector<64xf32> to vector<64x1xf32>
    %cst_25 = arith.constant 3.200000e+01 : f32
    %41 = vector.broadcast %cst_25 : f32 to vector<64x1xf32>
    %42 = arith.divf %40, %41 : vector<64x1xf32>
    %43 = vector.broadcast %42 : vector<64x1xf32> to vector<64x32xf32>
    %44 = arith.subf %36, %43 : vector<64x32xf32>
    %45 = arith.mulf %44, %44 : vector<64x32xf32>
    %cst_26 = arith.constant dense<0.000000e+00> : vector<64xf32>
    %46 = vector.multi_reduction <add>, %45, %cst_26 [1] : vector<64x32xf32> to vector<64xf32>
    %47 = vector.shape_cast %46 : vector<64xf32> to vector<64x1xf32>
    %cst_27 = arith.constant 3.200000e+01 : f32
    %48 = vector.broadcast %cst_27 : f32 to vector<64x1xf32>
    %49 = arith.divf %47, %48 : vector<64x1xf32>
    %50 = vector.broadcast %42 : vector<64x1xf32> to vector<64x32xf32>
    %51 = arith.subf %36, %50 : vector<64x32xf32>
    %cst_28 = arith.constant 9.99999974E-6 : f32
    %52 = vector.broadcast %cst_28 : f32 to vector<64x1xf32>
    %53 = arith.addf %49, %52 : vector<64x1xf32>
    %54 = math.rsqrt %53 : vector<64x1xf32>
    %55 = vector.broadcast %54 : vector<64x1xf32> to vector<64x32xf32>
    %56 = arith.mulf %51, %55 : vector<64x32xf32>
    %57 = vector.broadcast %37 : vector<1x32xf32> to vector<64x32xf32>
    %58 = arith.mulf %56, %57 : vector<64x32xf32>
    %59 = vector.broadcast %38 : vector<1x32xf32> to vector<64x32xf32>
    %60 = arith.addf %58, %59 : vector<64x32xf32>
    %cst_29 = arith.constant 0.000000e+00 : f32
    %61 = vector.broadcast %cst_29 : f32 to vector<64x32xf32>
    %62 = arith.maximumf %60, %61 : vector<64x32xf32>
    %c0_30 = arith.constant 0 : index
    %c0_31 = arith.constant 0 : index
    %63 = vector.load %arg10[%c0_30, %c0_31] : memref<32x8xf32, #tpu.memory_space<vmem>>, vector<32x8xf32>
    %cst_32 = arith.constant dense<0.000000e+00> : vector<64x8xf32>
    %64 = tpu.matmul %62, %63, %cst_32 {dimension_numbers = #tpu.dot_dimension_numbers<[1], [0], [0], [1], [0, 0, 1, 1], [], []>} : vector<64x32xf32>, vector<32x8xf32>, vector<64x8xf32> -> vector<64x8xf32>
    %c0_33 = arith.constant 0 : index
    %c0_34 = arith.constant 0 : index
    %65 = vector.load %arg11[%c0_33, %c0_34] : memref<1x8xf32, #tpu.memory_space<vmem>>, vector<1x8xf32>
    %66 = vector.broadcast %65 : vector<1x8xf32> to vector<64x8xf32>
    %67 = arith.addf %64, %66 : vector<64x8xf32>
    %68 = vector.extract_strided_slice %67 {offsets = [0, 0], sizes = [64, 4], strides = [1, 1]} : vector<64x8xf32> to vector<64x4xf32>
    %c0_35 = arith.constant 0 : index
    %c0_36 = arith.constant 0 : index
    %69 = vector.load %arg12[%c0_35, %c0_36] : memref<64x4xf32, #tpu.memory_space<vmem>>, vector<64x4xf32>
    tpu.vector_store %arg12[%c0_35, %c0_36], %68 {strides = array<i32>} : memref<64x4xf32, #tpu.memory_space<vmem>>, vector<64x4xf32>,
    %70 = vector.extract_strided_slice %67 {offsets = [0, 4], sizes = [64, 4], strides = [1, 1]} : vector<64x8xf32> to vector<64x4xf32>
    %cst_37 = arith.constant -2.000000e+01 : f32
    %cst_38 = arith.constant 2.000000e+00 : f32
    %71 = vector.broadcast %cst_37 : f32 to vector<64x4xf32>
    %72 = arith.maximumf %71, %70 : vector<64x4xf32>
    %73 = vector.broadcast %cst_38 : f32 to vector<64x4xf32>
    %74 = arith.minimumf %73, %72 : vector<64x4xf32>
    %c0_39 = arith.constant 0 : index
    %c0_40 = arith.constant 0 : index
    %75 = vector.load %arg13[%c0_39, %c0_40] : memref<64x4xf32, #tpu.memory_space<vmem>>, vector<64x4xf32>
    tpu.vector_store %arg13[%c0_39, %c0_40], %74 {strides = array<i32>} : memref<64x4xf32, #tpu.memory_space<vmem>>, vector<64x4xf32>,
    return
  }
  func.func @transform_0(%arg0: i32) -> (i32, i32) {
    %c0_i32 = arith.constant 0 : i32
    %c0_i32_0 = arith.constant 0 : i32
    return %arg0, %c0_i32 : i32, i32
  }
  func.func @transform_1(%arg0: i32) -> (i32, i32) {
    %c0_i32 = arith.constant 0 : i32
    %c0_i32_0 = arith.constant 0 : i32
    %c0_i32_1 = arith.constant 0 : i32
    return %c0_i32, %c0_i32_0 : i32, i32
  }
  func.func @transform_2(%arg0: i32) -> (i32, i32) {
    %c0_i32 = arith.constant 0 : i32
    %c0_i32_0 = arith.constant 0 : i32
    %c0_i32_1 = arith.constant 0 : i32
    return %c0_i32, %c0_i32_0 : i32, i32
  }
  func.func @transform_3(%arg0: i32) -> (i32, i32) {
    %c0_i32 = arith.constant 0 : i32
    %c0_i32_0 = arith.constant 0 : i32
    %c0_i32_1 = arith.constant 0 : i32
    return %c0_i32, %c0_i32_0 : i32, i32
  }
  func.func @transform_4(%arg0: i32) -> (i32, i32) {
    %c0_i32 = arith.constant 0 : i32
    %c0_i32_0 = arith.constant 0 : i32
    %c0_i32_1 = arith.constant 0 : i32
    return %c0_i32, %c0_i32_0 : i32, i32
  }
  func.func @transform_5(%arg0: i32) -> (i32, i32) {
    %c0_i32 = arith.constant 0 : i32
    %c0_i32_0 = arith.constant 0 : i32
    %c0_i32_1 = arith.constant 0 : i32
    return %c0_i32, %c0_i32_0 : i32, i32
  }
  func.func @transform_6(%arg0: i32) -> (i32, i32) {
    %c0_i32 = arith.constant 0 : i32
    %c0_i32_0 = arith.constant 0 : i32
    %c0_i32_1 = arith.constant 0 : i32
    return %c0_i32, %c0_i32_0 : i32, i32
  }
  func.func @transform_7(%arg0: i32) -> (i32, i32) {
    %c0_i32 = arith.constant 0 : i32
    %c0_i32_0 = arith.constant 0 : i32
    %c0_i32_1 = arith.constant 0 : i32
    return %c0_i32, %c0_i32_0 : i32, i32
  }
  func.func @transform_8(%arg0: i32) -> (i32, i32) {
    %c0_i32 = arith.constant 0 : i32
    %c0_i32_0 = arith.constant 0 : i32
    %c0_i32_1 = arith.constant 0 : i32
    return %c0_i32, %c0_i32_0 : i32, i32
  }
  func.func @transform_9(%arg0: i32) -> (i32, i32) {
    %c0_i32 = arith.constant 0 : i32
    %c0_i32_0 = arith.constant 0 : i32
    %c0_i32_1 = arith.constant 0 : i32
    return %c0_i32, %c0_i32_0 : i32, i32
  }
  func.func @transform_10(%arg0: i32) -> (i32, i32) {
    %c0_i32 = arith.constant 0 : i32
    %c0_i32_0 = arith.constant 0 : i32
    %c0_i32_1 = arith.constant 0 : i32
    return %c0_i32, %c0_i32_0 : i32, i32
  }
  func.func @transform_11(%arg0: i32) -> (i32, i32) {
    %c0_i32 = arith.constant 0 : i32
    %c0_i32_0 = arith.constant 0 : i32
    return %arg0, %c0_i32 : i32, i32
  }
  func.func @transform_12(%arg0: i32) -> (i32, i32) {
    %c0_i32 = arith.constant 0 : i32
    %c0_i32_0 = arith.constant 0 : i32
    return %arg0, %c0_i32 : i32, i32
  }
}

</mosaic_0001>

<bundles_post_ra>
// kernel: tpu_custom_call.1
= control target key start
LH: loop header
LB: loop body
LE: loop exit
PB: predicated region body
PF: predicated region fallthrough
CT: control target
= control target key end

     0   :  { %vm61_vm0 = vcmask 392192   ;;  %vm193_vm1 = vcmask 261120   ;;  %vm757_vm2 = vcmask 31744   ;;  %s1004_s17 = smov 124   ;;  %s1365_s1 = inlined_call_operand.vmem [shape: f32[48,32], index: 1, kind: input, shape index: {}]   ;;  %s1366_s0 = inlined_call_operand.vmem [shape: f32[64,48], index: 0, kind: input, shape index: {}]   ;;  %s1367_s2 = inlined_call_operand.vmem [shape: f32[1,32], index: 2, kind: input, shape index: {}]   ;;  %s1368_s5 = inlined_call_operand.vmem [shape: f32[32,32], index: 5, kind: input, shape index: {}]   ;;  %s1369_s3 = inlined_call_operand.vmem [shape: f32[1,32], index: 3, kind: input, shape index: {}]   ;;  %s1370_s4 = inlined_call_operand.vmem [shape: f32[1,32], index: 4, kind: input, shape index: {}]   ;;  %s1371_s6 = inlined_call_operand.vmem [shape: f32[1,32], index: 6, kind: input, shape index: {}]   ;;  %s1372_s9 = inlined_call_operand.vmem [shape: f32[32,8], index: 9, kind: input, shape index: {}]   ;;  %s1373_s7 = inlined_call_operand.vmem [shape: f32[1,32], index: 7, kind: input, shape index: {}]   ;;  %s1374_s8 = inlined_call_operand.vmem [shape: f32[1,32], index: 8, kind: input, shape index: {}]   ;;  %s1375_s10 = inlined_call_operand.vmem [shape: f32[1,8], index: 10, kind: input, shape index: {}]   ;;  %s1376_s11 = inlined_call_operand.vmem [shape: f32[64,4], index: 11, kind: output, shape index: {0}]   ;;  %s1377_s12 = inlined_call_operand.vmem [shape: f32[64,4], index: 12, kind: output, shape index: {1}]  }
   0x1   :  { %v53_v0 = vld [vmem:[%s1365_s1 + $0x28] sm:$0xff]  ;;  %v52_v1 = vld [vmem:[%s1365_s1 + $0x20] sm:$0xff]  ;;  %v51_v2 = vld [vmem:[%s1365_s1 + $0x18] sm:$0xff] }
   0x2   :  { %899 = vmatprep.subr.mxu0 %v53_v0  ;;  %v40_v3 = vld [vmem:[%s1366_s0] sm:$0xff]  ;;  %v50_v4 = vld [vmem:[%s1365_s1 + $0x10] sm:$0xff]  ;;  %v49_v5 = vld [vmem:[%s1365_s1 + $0x8] sm:$0xff] }
   0x3   :  { %900 = vmatpush3.msra.mxu0 %v53_v0  ;;  %911 = vmatprep.mubr.msk.f32.mxu0 %vm61_vm0, %v40_v3  ;;  %v48_v6 = vld [vmem:[%s1365_s1] sm:$0xff]  ;;  %v41_v7 = vld [vmem:[%s1366_s0 + $0x8] sm:$0xff]  ;;  %v42_v8 = vld [vmem:[%s1366_s0 + $0x10] sm:$0xff] }
   0x4   :  { %901 = vmatprep.subr.mxu0 %v52_v1  ;;  %v43_v9 = vld [vmem:[%s1366_s0 + $0x18] sm:$0xff]  ;;  %v44_v10 = vld [vmem:[%s1366_s0 + $0x20] sm:$0xff]  ;;  %v45_v11 = vld [vmem:[%s1366_s0 + $0x28] sm:$0xff] }
   0x5   :  { %902 = vmatpush3.msra.mxu0 %v52_v1  ;;  %v46_v12 = vld [vmem:[%s1366_s0 + $0x30] sm:$0xff]  ;;  %v47_v13 = vld [vmem:[%s1366_s0 + $0x38] sm:$0xff]  ;;  %v830_v15 = vld [vmem:[%s1367_s2] ss:$0 sm:$0xff] }
   0x6   :  { %903 = vmatprep.subr.mxu0 %v51_v2 }
   0x7   :  { %904 = vmatpush3.msra.mxu0 %v51_v2 }
   0x8   :  { %905 = vmatprep.subr.mxu0 %v50_v4 }
   0x9   :  { %906 = vmatpush3.msra.mxu0 %v50_v4 }
   0xa   :  { %907 = vmatprep.subr.mxu0 %v49_v5 }
   0xb   :  { %908 = vmatpush3.msra.mxu0 %v49_v5 }
   0xc   :  { %909 = vmatprep.subr.mxu0 %v48_v6 }
   0xd   :  { %910 = vmatpush3.msra.mxu0 %v48_v6 }
   0xe   :  { %912 = vmatmul.mubr.msk.f32.vlgmr.msra.gmra.mxu0 %vm61_vm0, %v41_v7 }
   0xf   :  { %914 = vmatprep.mubr.msk.f32.mxu0 %vm61_vm0, %v42_v8 }
  0x12   :  { %915 = vmatmul.mubr.msk.f32.gmra.mxu0 %vm61_vm0, %v43_v9 }
  0x13   :  { %917 = vmatprep.mubr.msk.f32.mxu0 %vm61_vm0, %v44_v10 }
  0x16   :  { %918 = vmatmul.mubr.msk.f32.gmra.mxu0 %vm61_vm0, %v45_v11 }
  0x17   :  { %920 = vmatprep.mubr.msk.f32.mxu0 %vm61_vm0, %v46_v12 }
  0x1a   :  { %921 = vmatmul.mubr.msk.f32.gmra.mxu0 %vm61_vm0, %v47_v13 }
  0xce   :  { %v913_v14 = vpop.f32.mrf.mxu0 }
  0xcf   :  { %v158_v19 = vadd.f32 %v913_v14, %v830_v15 }
  0xd0   :  { %v152_v16 = vpop.f32.mrf.mxu0 }
  0xd1   :  { %v153_v17 = vadd.f32 %v830_v15, %v152_v16  ;;  %v197_v26 = vsel %vm193_vm1, %v158_v19, 0.0  ;;  %v337_v16 = vld [vmem:[%s1368_s5 + $0x10] sm:$0xff] }
  0xd2   :  { %v916_v18 = vpop.f32.mrf.mxu0 }
  0xd3   :  { %v194_v20 = vsel %vm193_vm1, %v153_v17, 0.0  ;;  %v168_v24 = vadd.f32 %v916_v18, %v830_v15  ;;  %v335_v18 = vld [vmem:[%s1368_s5] sm:$0xff] }
  0xd4   :  { %v162_v21 = vpop.f32.mrf.mxu0  ;;  %195 = vadd.xlane.f32.xlu0 %v194_v20 }
  0xd5   :  { %v163_v22 = vadd.f32 %v830_v15, %v162_v21  ;;  %v203_v31 = vsel %vm193_vm1, %v168_v24, 0.0 }
  0xd6   :  { %v919_v23 = vpop.f32.mrf.mxu0 }
  0xd7   :  { %v200_v25 = vsel %vm193_vm1, %v163_v22, 0.0  ;;  %v178_v28 = vadd.f32 %v919_v23, %v830_v15 }
  0xd8   :  { %v172_v27 = vpop.f32.mrf.mxu0  ;;  %201 = vadd.xlane.f32.xlu1 %v200_v25  ;;  %198 = vadd.xlane.f32.xlu0 %v197_v26 }
  0xd9   :  { %v173_v29 = vadd.f32 %v830_v15, %v172_v27  ;;  %v209_v36 = vsel %vm193_vm1, %v178_v28, 0.0 }
  0xda   :  { %v922_v30 = vpop.f32.mrf.mxu0 }
  0xdb   :  { %v206_v32 = vsel %vm193_vm1, %v173_v29, 0.0  ;;  %v188_v34 = vadd.f32 %v922_v30, %v830_v15 }
  0xdc   :  { %v182_v33 = vpop.f32.mrf.mxu0  ;;  %204 = vadd.xlane.f32.xlu1 %v203_v31  ;;  %207 = vadd.xlane.f32.xlu0 %v206_v32 }
  0xdd   :  { %v183_v35 = vadd.f32 %v830_v15, %v182_v33  ;;  %v215_v38 = vsel %vm193_vm1, %v188_v34, 0.0  ;;  %v338_v15 = vld [vmem:[%s1368_s5 + $0x18] sm:$0xff] }
  0xde   :  { %923 = vmatprep.subr.mxu0 %v338_v15  ;;  %963 = vmatprep.subr.mxu1 %v338_v15 }
  0xdf   :  { %v212_v37 = vsel %vm193_vm1, %v183_v35, 0.0  ;;  %924 = vmatpush3.msra.mxu0 %v338_v15  ;;  %967 = vmatpush3.msra.mxu1 %v338_v15 }
  0xe0   :  { %210 = vadd.xlane.f32.xlu1 %v209_v36  ;;  %213 = vadd.xlane.f32.xlu0 %v212_v37 }
  0xe1   :  { %925 = vmatprep.subr.mxu0 %v337_v16  ;;  %964 = vmatprep.subr.mxu1 %v337_v16 }
  0xe2   :  { %926 = vmatpush3.msra.mxu0 %v337_v16  ;;  %968 = vmatpush3.msra.mxu1 %v337_v16 }
  0xe4   :  { %216 = vadd.xlane.f32.xlu1 %v215_v38 }
 0x15d   :  { %v196_v39 = vpop.xlane.xlu0 %195 }
 0x15e   :  { %v219_v40 = vmul.f32 0.03125, %v196_v39 }
 0x160   :  { %v1131_v41 = vsub.f32 %v153_v17, %v219_v40  ;;  %v336_v17 = vld [vmem:[%s1368_s5 + $0x8] sm:$0xff] }
 0x161   :  { %v202_v42 = vpop.xlane.xlu1 %201  ;;  %v199_v43 = vpop.xlane.xlu0 %198  ;;  %927 = vmatprep.subr.mxu0 %v336_v17  ;;  %965 = vmatprep.subr.mxu1 %v336_v17 }
 0x162   :  { %v221_v44 = vmul.f32 0.03125, %v202_v42  ;;  %v220_v45 = vmul.f32 0.03125, %v199_v43  ;;  %v235_v46 = vmul.f32 %v1131_v41, %v1131_v41  ;;  %928 = vmatpush3.msra.mxu0 %v336_v17  ;;  %969 = vmatpush3.msra.mxu1 %v336_v17 }
 0x163   :  { %929 = vmatprep.subr.mxu0 %v335_v18  ;;  %966 = vmatprep.subr.mxu1 %v335_v18 }
 0x164   :  { %v1135_v47 = vsub.f32 %v163_v22, %v221_v44  ;;  %v1137_v48 = vsub.f32 %v158_v19, %v220_v45  ;;  %v243_v49 = vsel %vm193_vm1, %v235_v46, 0.0  ;;  %930 = vmatpush3.msra.mxu0 %v335_v18  ;;  %970 = vmatpush3.msra.mxu1 %v335_v18  ;;  %v839_v44 = vld [vmem:[%s1369_s3] ss:$0 sm:$0xff] }
 0x165   :  { %v205_v50 = vpop.xlane.xlu1 %204  ;;  %244 = vadd.xlane.f32.xlu0 %v243_v49  ;;  %v208_v51 = vpop.xlane.xlu0 %207  ;;  %v840_v49 = vld [vmem:[%s1370_s4] ss:$0 sm:$0xff] }
 0x166   :  { %v222_v52 = vmul.f32 0.03125, %v205_v50  ;;  %v223_v53 = vmul.f32 0.03125, %v208_v51  ;;  %v237_v54 = vmul.f32 %v1135_v47, %v1135_v47  ;;  %v236_v55 = vmul.f32 %v1137_v48, %v1137_v48 }
 0x168   :  { %v1144_v56 = vsub.f32 %v168_v24, %v222_v52  ;;  %v1146_v57 = vsub.f32 %v173_v29, %v223_v53  ;;  %v249_v58 = vsel %vm193_vm1, %v237_v54, 0.0  ;;  %v246_v59 = vsel %vm193_vm1, %v236_v55, 0.0 }
 0x169   :  { %v211_v60 = vpop.xlane.xlu1 %210  ;;  %250 = vadd.xlane.f32.xlu0 %v249_v58  ;;  %247 = vadd.xlane.f32.xlu1 %v246_v59  ;;  %v214_v61 = vpop.xlane.xlu0 %213 }
 0x16a   :  { %v224_v62 = vmul.f32 0.03125, %v211_v60  ;;  %v225_v63 = vmul.f32 0.03125, %v214_v61  ;;  %v238_v0 = vmul.f32 %v1144_v56, %v1144_v56  ;;  %v239_v1 = vmul.f32 %v1146_v57, %v1146_v57 }
 0x16c   :  { %v1154_v2 = vsub.f32 %v178_v28, %v224_v62  ;;  %v1156_v3 = vsub.f32 %v183_v35, %v225_v63  ;;  %v252_v4 = vsel %vm193_vm1, %v238_v0, 0.0  ;;  %v255_v5 = vsel %vm193_vm1, %v239_v1, 0.0 }
 0x16d   :  { %v217_v6 = vpop.xlane.xlu1 %216  ;;  %253 = vadd.xlane.f32.xlu1 %v252_v4  ;;  %256 = vadd.xlane.f32.xlu0 %v255_v5 }
 0x16e   :  { %v226_v7 = vmul.f32 0.03125, %v217_v6  ;;  %v240_v8 = vmul.f32 %v1154_v2, %v1154_v2  ;;  %v241_v9 = vmul.f32 %v1156_v3, %v1156_v3 }
 0x170   :  { %v1164_v10 = vsub.f32 %v188_v34, %v226_v7  ;;  %v258_v11 = vsel %vm193_vm1, %v240_v8, 0.0  ;;  %v261_v12 = vsel %vm193_vm1, %v241_v9, 0.0 }
 0x171   :  { %259 = vadd.xlane.f32.xlu1 %v258_v11  ;;  %262 = vadd.xlane.f32.xlu0 %v261_v12 }
 0x172   :  { %v242_v13 = vmul.f32 %v1164_v10, %v1164_v10 }
 0x174   :  { %v264_v14 = vsel %vm193_vm1, %v242_v13, 0.0 }
 0x175   :  { %265 = vadd.xlane.f32.xlu1 %v264_v14 }
 0x1ee   :  { %v245_v19 = vpop.xlane.xlu0 %244 }
 0x1ef   :  { %v267_v20 = vmul.f32 0.03125, %v245_v19 }
 0x1f1   :  { %v275_v21 = vadd.f32 1e-05, %v267_v20 }
 0x1f2   :  { %v248_v22 = vpop.xlane.xlu1 %247  ;;  %v251_v23 = vpop.xlane.xlu0 %250 }
 0x1f3   :  { %972 = vrsqrt.f32 %v275_v21  ;;  %v268_v24 = vmul.f32 0.03125, %v248_v22  ;;  %v269_v25 = vmul.f32 0.03125, %v251_v23  ;;  %v841_v22 = vld [vmem:[%s1371_s6] ss:$0 sm:$0xff] }
 0x1f5   :  { %v276_v26 = vadd.f32 1e-05, %v268_v24  ;;  %v277_v27 = vadd.f32 1e-05, %v269_v25 }
 0x1f6   :  { %v254_v28 = vpop.xlane.xlu1 %253  ;;  %v257_v29 = vpop.xlane.xlu0 %256 }
 0x1f7   :  { %974 = vrsqrt.f32 %v276_v26  ;;  %v270_v30 = vmul.f32 0.03125, %v254_v28  ;;  %v271_v31 = vmul.f32 0.03125, %v257_v29 }
 0x1f8   :  { %976 = vrsqrt.f32 %v277_v27 }
 0x1f9   :  { %v278_v32 = vadd.f32 1e-05, %v270_v30  ;;  %v279_v33 = vadd.f32 1e-05, %v271_v31 }
 0x1fa   :  { %v260_v34 = vpop.xlane.xlu1 %259  ;;  %v263_v35 = vpop.xlane.xlu0 %262 }
 0x1fb   :  { %978 = vrsqrt.f32 %v278_v32  ;;  %v272_v36 = vmul.f32 0.03125, %v260_v34  ;;  %v273_v37 = vmul.f32 0.03125, %v263_v35 }
 0x1fc   :  { %980 = vrsqrt.f32 %v279_v33 }
 0x1fd   :  { %v280_v38 = vadd.f32 1e-05, %v272_v36  ;;  %v281_v39 = vadd.f32 1e-05, %v273_v37 }
 0x1fe   :  { %v266_v40 = vpop.xlane.xlu1 %265 }
 0x1ff   :  { %982 = vrsqrt.f32 %v280_v38  ;;  %v274_v42 = vmul.f32 0.03125, %v266_v40 }
 0x200   :  { %v973_v43 = vpop.eup %972  ;;  %984 = vrsqrt.f32 %v281_v39 }
 0x201   :  { %v282_v45 = vadd.f32 1e-05, %v274_v42  ;;  %v291_v46 = vmul.f32 %v973_v43, %v1131_v41 }
 0x203   :  { %986 = vrsqrt.f32 %v282_v45  ;;  %v305_v50 = vmul.f32 %v839_v44, %v291_v46 }
 0x204   :  { %v975_v51 = vpop.eup %974 }
 0x205   :  { %v977_v52 = vpop.eup %976  ;;  %v292_v53 = vmul.f32 %v975_v51, %v1137_v48  ;;  %v319_v54 = vadd.f32 %v840_v49, %v305_v50 }
 0x206   :  { %v293_v55 = vmul.f32 %v977_v52, %v1135_v47 }
 0x207   :  { %v306_v58 = vmul.f32 %v839_v44, %v292_v53  ;;  %v327_v59 = vmax.f32 %v319_v54, 0.0 }
 0x208   :  { %v979_v60 = vpop.eup %978  ;;  %v307_v61 = vmul.f32 %v839_v44, %v293_v55 }
 0x209   :  { %v981_v62 = vpop.eup %980  ;;  %931 = vmatprep.mubr.msk.f32.mxu0 %vm193_vm1, %v327_v59  ;;  %v320_v41 = vadd.f32 %v840_v49, %v306_v58  ;;  %v294_v63 = vmul.f32 %v979_v60, %v1144_v56 }
 0x20a   :  { %v321_v0 = vadd.f32 %v840_v49, %v307_v61  ;;  %v295_v1 = vmul.f32 %v981_v62, %v1146_v57 }
 0x20b   :  { %v328_v4 = vmax.f32 %v320_v41, 0.0  ;;  %v308_v5 = vmul.f32 %v839_v44, %v294_v63 }
 0x20c   :  { %v983_v6 = vpop.eup %982  ;;  %v329_v48 = vmax.f32 %v321_v0, 0.0  ;;  %v309_v7 = vmul.f32 %v839_v44, %v295_v1 }
 0x20d   :  { %v985_v8 = vpop.eup %984  ;;  %932 = vmatmul.mubr.msk.f32.vlgmr.msra.gmra.mxu0 %vm193_vm1, %v328_v4  ;;  %v322_v47 = vadd.f32 %v840_v49, %v308_v5  ;;  %v296_v9 = vmul.f32 %v983_v6, %v1154_v2 }
 0x20e   :  { %934 = vmatprep.mubr.msk.f32.mxu0 %vm193_vm1, %v329_v48  ;;  %v323_v11 = vadd.f32 %v840_v49, %v309_v7  ;;  %v297_v12 = vmul.f32 %v985_v8, %v1156_v3 }
 0x20f   :  { %v330_v56 = vmax.f32 %v322_v47, 0.0  ;;  %v310_v13 = vmul.f32 %v839_v44, %v296_v9 }
 0x210   :  { %v987_v14 = vpop.eup %986  ;;  %v331_v57 = vmax.f32 %v323_v11, 0.0  ;;  %v311_v15 = vmul.f32 %v839_v44, %v297_v12 }
 0x211   :  { %935 = vmatmul.mubr.msk.f32.gmra.mxu0 %vm193_vm1, %v330_v56  ;;  %v324_v16 = vadd.f32 %v840_v49, %v310_v13  ;;  %v298_v17 = vmul.f32 %v987_v14, %v1164_v10 }
 0x212   :  { %937 = vmatprep.mubr.msk.f32.mxu1 %vm193_vm1, %v331_v57  ;;  %v325_v18 = vadd.f32 %v840_v49, %v311_v15 }
 0x213   :  { %v332_v19 = vmax.f32 %v324_v16, 0.0  ;;  %v312_v2 = vmul.f32 %v839_v44, %v298_v17 }
 0x214   :  { %v333_v20 = vmax.f32 %v325_v18, 0.0 }
 0x215   :  { %938 = vmatmul.mubr.msk.f32.vlgmr.msra.gmra.mxu1 %vm193_vm1, %v332_v19  ;;  %v326_v21 = vadd.f32 %v840_v49, %v312_v2 }
 0x216   :  { %940 = vmatprep.mubr.msk.f32.mxu1 %vm193_vm1, %v333_v20 }
 0x217   :  { %v334_v3 = vmax.f32 %v326_v21, 0.0 }
 0x219   :  { %941 = vmatmul.mubr.msk.f32.gmra.mxu1 %vm193_vm1, %v334_v3 }
 0x2cd   :  { %v933_v23 = vpop.f32.mrf.mxu0 }
 0x2ce   :  { %v442_v10 = vadd.f32 %v933_v23, %v841_v22  ;;  %v620_v23 = vld [vmem:[%s1372_s9 + $0x18] sm:$0xff] }
 0x2cf   :  { %v436_v24 = vpop.f32.mrf.mxu0  ;;  %943 = vmatprep.subr.mxu1 %v620_v23 }
 0x2d0   :  { %v437_v25 = vadd.f32 %v841_v22, %v436_v24  ;;  %v480_v26 = vsel %vm193_vm1, %v442_v10, 0.0  ;;  %944 = vmatpush3.msra.mxu1 %v620_v23  ;;  %v618_v24 = vld [vmem:[%s1372_s9 + $0x8] sm:$0xff] }
 0x2d1   :  { %481 = vadd.xlane.f32.xlu1 %v480_v26  ;;  %v936_v27 = vpop.f32.mrf.mxu0 }
 0x2d2   :  { %v452_v28 = vadd.f32 %v936_v27, %v841_v22  ;;  %v477_v29 = vsel %vm193_vm1, %v437_v25, 0.0 }
 0x2d3   :  { %478 = vadd.xlane.f32.xlu0 %v477_v29  ;;  %v446_v30 = vpop.f32.mrf.mxu0 }
 0x2d4   :  { %v447_v31 = vadd.f32 %v841_v22, %v446_v30  ;;  %v486_v32 = vsel %vm193_vm1, %v452_v28, 0.0 }
 0x2d5   :  { %487 = vadd.xlane.f32.xlu1 %v486_v32  ;;  %v939_v33 = vpop.f32.mrf.mxu1 }
 0x2d6   :  { %v462_v34 = vadd.f32 %v939_v33, %v841_v22  ;;  %v483_v35 = vsel %vm193_vm1, %v447_v31, 0.0 }
 0x2d7   :  { %484 = vadd.xlane.f32.xlu0 %v483_v35  ;;  %v456_v36 = vpop.f32.mrf.mxu1 }
 0x2d8   :  { %v457_v37 = vadd.f32 %v841_v22, %v456_v36  ;;  %v492_v38 = vsel %vm193_vm1, %v462_v34, 0.0 }
 0x2d9   :  { %493 = vadd.xlane.f32.xlu1 %v492_v38  ;;  %v942_v39 = vpop.f32.mrf.mxu1 }
 0x2da   :  { %v472_v40 = vadd.f32 %v942_v39, %v841_v22  ;;  %v489_v42 = vsel %vm193_vm1, %v457_v37, 0.0 }
 0x2db   :  { %490 = vadd.xlane.f32.xlu0 %v489_v42  ;;  %v466_v43 = vpop.f32.mrf.mxu1 }
 0x2dc   :  { %v467_v44 = vadd.f32 %v841_v22, %v466_v43  ;;  %v498_v45 = vsel %vm193_vm1, %v472_v40, 0.0 }
 0x2dd   :  { %499 = vadd.xlane.f32.xlu1 %v498_v45 }
 0x2de   :  { %v495_v46 = vsel %vm193_vm1, %v467_v44, 0.0 }
 0x2df   :  { %496 = vadd.xlane.f32.xlu0 %v495_v46 }
 0x35a   :  { %v482_v49 = vpop.xlane.xlu1 %481 }
 0x35b   :  { %v502_v50 = vmul.f32 0.03125, %v482_v49 }
 0x35c   :  { %v479_v51 = vpop.xlane.xlu0 %478 }
 0x35d   :  { %v1216_v52 = vsub.f32 %v442_v10, %v502_v50  ;;  %v501_v53 = vmul.f32 0.03125, %v479_v51  ;;  %v619_v10 = vld [vmem:[%s1372_s9 + $0x10] sm:$0xff] }
 0x35e   :  { %v488_v54 = vpop.xlane.xlu1 %487  ;;  %945 = vmatprep.subr.mxu1 %v619_v10 }
 0x35f   :  { %v1218_v55 = vsub.f32 %v437_v25, %v501_v53  ;;  %v504_v58 = vmul.f32 0.03125, %v488_v54  ;;  %v518_v59 = vmul.f32 %v1216_v52, %v1216_v52  ;;  %946 = vmatpush3.msra.mxu1 %v619_v10  ;;  %v617_v25 = vld [vmem:[%s1372_s9] sm:$0xff] }
 0x360   :  { %v485_v60 = vpop.xlane.xlu0 %484  ;;  %947 = vmatprep.subr.mxu1 %v618_v24 }
 0x361   :  { %v1222_v61 = vsub.f32 %v452_v28, %v504_v58  ;;  %v503_v62 = vmul.f32 0.03125, %v485_v60  ;;  %v528_v41 = vsel %vm193_vm1, %v518_v59, 0.0  ;;  %v517_v63 = vmul.f32 %v1218_v55, %v1218_v55  ;;  %948 = vmatpush3.msra.mxu1 %v618_v24  ;;  %v850_v58 = vld [vmem:[%s1373_s7] ss:$0 sm:$0xff] }
 0x362   :  { %v494_v0 = vpop.xlane.xlu1 %493  ;;  %529 = vadd.xlane.f32.xlu1 %v528_v41  ;;  %949 = vmatprep.subr.mxu1 %v617_v25  ;;  %v851_v41 = vld [vmem:[%s1374_s8] ss:$0 sm:$0xff] }
 0x363   :  { %v1227_v1 = vsub.f32 %v447_v31, %v503_v62  ;;  %v506_v4 = vmul.f32 0.03125, %v494_v0  ;;  %v525_v5 = vsel %vm193_vm1, %v517_v63, 0.0  ;;  %v520_v6 = vmul.f32 %v1222_v61, %v1222_v61  ;;  %950 = vmatpush3.msra.mxu1 %v617_v25 }
 0x364   :  { %526 = vadd.xlane.f32.xlu0 %v525_v5  ;;  %v491_v48 = vpop.xlane.xlu0 %490 }
 0x365   :  { %v1232_v7 = vsub.f32 %v462_v34, %v506_v4  ;;  %v505_v8 = vmul.f32 0.03125, %v491_v48  ;;  %v534_v47 = vsel %vm193_vm1, %v520_v6, 0.0  ;;  %v519_v9 = vmul.f32 %v1227_v1, %v1227_v1 }
 0x366   :  { %535 = vadd.xlane.f32.xlu1 %v534_v47  ;;  %v500_v11 = vpop.xlane.xlu1 %499 }
 0x367   :  { %v1237_v12 = vsub.f32 %v457_v37, %v505_v8  ;;  %v508_v56 = vmul.f32 0.03125, %v500_v11  ;;  %v531_v13 = vsel %vm193_vm1, %v519_v9, 0.0  ;;  %v522_v14 = vmul.f32 %v1232_v7, %v1232_v7 }
 0x368   :  { %532 = vadd.xlane.f32.xlu0 %v531_v13  ;;  %v497_v57 = vpop.xlane.xlu0 %496 }
 0x369   :  { %v1242_v15 = vsub.f32 %v472_v40, %v508_v56  ;;  %v507_v16 = vmul.f32 0.03125, %v497_v57  ;;  %v540_v17 = vsel %vm193_vm1, %v522_v14, 0.0  ;;  %v521_v18 = vmul.f32 %v1237_v12, %v1237_v12 }
 0x36a   :  { %541 = vadd.xlane.f32.xlu1 %v540_v17 }
 0x36b   :  { %v1247_v19 = vsub.f32 %v467_v44, %v507_v16  ;;  %v537_v2 = vsel %vm193_vm1, %v521_v18, 0.0  ;;  %v524_v20 = vmul.f32 %v1242_v15, %v1242_v15 }
 0x36c   :  { %538 = vadd.xlane.f32.xlu0 %v537_v2 }
 0x36d   :  { %v546_v21 = vsel %vm193_vm1, %v524_v20, 0.0  ;;  %v523_v3 = vmul.f32 %v1247_v19, %v1247_v19 }
 0x36e   :  { %547 = vadd.xlane.f32.xlu1 %v546_v21 }
 0x36f   :  { %v543_v22 = vsel %vm193_vm1, %v523_v3, 0.0 }
 0x370   :  { %544 = vadd.xlane.f32.xlu0 %v543_v22 }
 0x3eb   :  { %v530_v26 = vpop.xlane.xlu1 %529 }
 0x3ec   :  { %v550_v27 = vmul.f32 0.03125, %v530_v26 }
 0x3ed   :  { %v527_v28 = vpop.xlane.xlu0 %526 }
 0x3ee   :  { %v558_v29 = vadd.f32 1e-05, %v550_v27  ;;  %v549_v30 = vmul.f32 0.03125, %v527_v28 }
 0x3ef   :  { %v536_v31 = vpop.xlane.xlu1 %535 }
 0x3f0   :  { %988 = vrsqrt.f32 %v558_v29  ;;  %v557_v32 = vadd.f32 1e-05, %v549_v30  ;;  %v552_v33 = vmul.f32 0.03125, %v536_v31 }
 0x3f1   :  { %v533_v34 = vpop.xlane.xlu0 %532 }
 0x3f2   :  { %990 = vrsqrt.f32 %v557_v32  ;;  %v560_v35 = vadd.f32 1e-05, %v552_v33  ;;  %v551_v36 = vmul.f32 0.03125, %v533_v34 }
 0x3f3   :  { %v542_v37 = vpop.xlane.xlu1 %541 }
 0x3f4   :  { %992 = vrsqrt.f32 %v560_v35  ;;  %v559_v38 = vadd.f32 1e-05, %v551_v36  ;;  %v554_v39 = vmul.f32 0.03125, %v542_v37 }
 0x3f5   :  { %v539_v40 = vpop.xlane.xlu0 %538 }
 0x3f6   :  { %994 = vrsqrt.f32 %v559_v38  ;;  %v562_v42 = vadd.f32 1e-05, %v554_v39  ;;  %v553_v43 = vmul.f32 0.03125, %v539_v40 }
 0x3f7   :  { %v548_v44 = vpop.xlane.xlu1 %547 }
 0x3f8   :  { %996 = vrsqrt.f32 %v562_v42  ;;  %v561_v45 = vadd.f32 1e-05, %v553_v43  ;;  %v556_v46 = vmul.f32 0.03125, %v548_v44 }
 0x3f9   :  { %v545_v49 = vpop.xlane.xlu0 %544 }
 0x3fa   :  { %998 = vrsqrt.f32 %v561_v45  ;;  %v564_v50 = vadd.f32 1e-05, %v556_v46  ;;  %v555_v51 = vmul.f32 0.03125, %v545_v49 }
 0x3fc   :  { %1000 = vrsqrt.f32 %v564_v50  ;;  %v563_v53 = vadd.f32 1e-05, %v555_v51 }
 0x3fd   :  { %v989_v54 = vpop.eup %988 }
 0x3fe   :  { %v574_v59 = vmul.f32 %v989_v54, %v1216_v52  ;;  %1002 = vrsqrt.f32 %v563_v53 }
 0x3ff   :  { %v991_v60 = vpop.eup %990 }
 0x400   :  { %v588_v62 = vmul.f32 %v850_v58, %v574_v59  ;;  %v573_v63 = vmul.f32 %v991_v60, %v1218_v55 }
 0x401   :  { %v993_v0 = vpop.eup %992 }
 0x402   :  { %v587_v4 = vmul.f32 %v850_v58, %v573_v63  ;;  %v576_v5 = vmul.f32 %v993_v0, %v1222_v61  ;;  %v602_v48 = vadd.f32 %v851_v41, %v588_v62 }
 0x403   :  { %v995_v6 = vpop.eup %994 }
 0x404   :  { %v601_v8 = vadd.f32 %v851_v41, %v587_v4  ;;  %v575_v47 = vmul.f32 %v995_v6, %v1227_v1  ;;  %v590_v9 = vmul.f32 %v850_v58, %v576_v5  ;;  %v610_v57 = vmax.f32 %v602_v48, 0.0 }
 0x405   :  { %v997_v52 = vpop.eup %996 }
 0x406   :  { %v609_v11 = vmax.f32 %v601_v8, 0.0  ;;  %v589_v56 = vmul.f32 %v850_v58, %v575_v47  ;;  %v578_v13 = vmul.f32 %v997_v52, %v1232_v7  ;;  %v604_v16 = vadd.f32 %v851_v41, %v590_v9 }
 0x407   :  { %v999_v14 = vpop.eup %998 }
 0x408   :  { %951 = vmatprep.mubr.msk.f32.mxu1 %vm193_vm1, %v609_v11  ;;  %v603_v55 = vadd.f32 %v851_v41, %v589_v56  ;;  %v577_v17 = vmul.f32 %v999_v14, %v1237_v12  ;;  %v592_v61 = vmul.f32 %v850_v58, %v578_v13  ;;  %v612_v3 = vmax.f32 %v604_v16, 0.0 }
 0x409   :  { %v1001_v18 = vpop.eup %1000  ;;  %952 = vmatmul.mubr.msk.f32.vlgmr.msra.gmra.mxu1 %vm193_vm1, %v610_v57 }
 0x40a   :  { %v611_v2 = vmax.f32 %v603_v55, 0.0  ;;  %v591_v1 = vmul.f32 %v850_v58, %v577_v17  ;;  %v580_v20 = vmul.f32 %v1001_v18, %v1242_v15  ;;  %v606_v22 = vadd.f32 %v851_v41, %v592_v61 }
 0x40b   :  { %v1003_v21 = vpop.eup %1002 }
 0x40c   :  { %954 = vmatprep.mubr.msk.f32.mxu1 %vm193_vm1, %v611_v2  ;;  %v605_v7 = vadd.f32 %v851_v41, %v591_v1  ;;  %v579_v23 = vmul.f32 %v1003_v21, %v1247_v19  ;;  %v594_v10 = vmul.f32 %v850_v58, %v580_v20  ;;  %v614_v25 = vmax.f32 %v606_v22, 0.0  ;;  %v852_v19 = vld [vmem:[%s1375_s10] ss:$0 sm:$0xff] }
 0x40d   :  { %955 = vmatmul.mubr.msk.f32.gmra.mxu1 %vm193_vm1, %v612_v3 }
 0x40e   :  { %v613_v12 = vmax.f32 %v605_v7, 0.0  ;;  %v593_v24 = vmul.f32 %v850_v58, %v579_v23  ;;  %v608_v26 = vadd.f32 %v851_v41, %v594_v10 }
 0x410   :  { %957 = vmatprep.mubr.msk.f32.mxu1 %vm193_vm1, %v613_v12  ;;  %v607_v27 = vadd.f32 %v851_v41, %v593_v24  ;;  %v616_v28 = vmax.f32 %v608_v26, 0.0 }
 0x411   :  { %958 = vmatmul.mubr.msk.f32.gmra.mxu1 %vm193_vm1, %v614_v25 }
 0x412   :  { %v615_v15 = vmax.f32 %v607_v27, 0.0 }
 0x414   :  { %960 = vmatprep.mubr.msk.f32.mxu1 %vm193_vm1, %v615_v15 }
 0x415   :  { %961 = vmatmul.mubr.msk.f32.gmra.mxu1 %vm193_vm1, %v616_v28 }
 0x4c9   :  { %v953_v29 = vpop.f32.mrf.mxu1 }
 0x4ca   :  { %v724_v30 = vadd.f32 %v953_v29, %v852_v19 }
 0x4cb   :  { %v718_v31 = vpop.f32.mrf.mxu1 }
 0x4cc   :  { %759 = vst.msk [vmem:[%s1376_s11 + $0x8] sm:$0xff] %vm757_vm2, %v724_v30  ;;  %v767_v32 = vmax.f32 %v724_v30, -20.0  ;;  %v719_v33 = vadd.f32 %v852_v19, %v718_v31 }
 0x4cd   :  { %v956_v34 = vpop.f32.mrf.mxu1 }
 0x4ce   :  { %v775_v35 = vmin.f32 %v767_v32, 2.0  ;;  %758 = vst.msk [vmem:[%s1376_s11] sm:$0xff] %vm757_vm2, %v719_v33  ;;  %v766_v36 = vmax.f32 %v719_v33, -20.0  ;;  %v734_v37 = vadd.f32 %v956_v34, %v852_v19 }
 0x4cf   :  { %v728_v38 = vpop.f32.mrf.mxu1 }
 0x4d0   :  { %v774_v39 = vmin.f32 %v766_v36, 2.0  ;;  %761 = vst.msk [vmem:[%s1376_s11 + $0x18] sm:$0xff] %vm757_vm2, %v734_v37  ;;  %v769_v40 = vmax.f32 %v734_v37, -20.0  ;;  %v729_v42 = vadd.f32 %v852_v19, %v728_v38  ;;  %792 = vrot.lane.b32.xlu1 %v775_v35, %s1004_s17 }
 0x4d1   :  { %v959_v43 = vpop.f32.mrf.mxu1 }
 0x4d2   :  { %v777_v44 = vmin.f32 %v769_v40, 2.0  ;;  %760 = vst.msk [vmem:[%s1376_s11 + $0x10] sm:$0xff] %vm757_vm2, %v729_v42  ;;  %v768_v45 = vmax.f32 %v729_v42, -20.0  ;;  %v744_v46 = vadd.f32 %v959_v43, %v852_v19  ;;  %790 = vrot.lane.b32.xlu0 %v774_v39, %s1004_s17 }
 0x4d3   :  { %v738_v49 = vpop.f32.mrf.mxu1 }
 0x4d4   :  { %763 = vst.msk [vmem:[%s1376_s11 + $0x28] sm:$0xff] %vm757_vm2, %v744_v46  ;;  %v739_v50 = vadd.f32 %v852_v19, %v738_v49  ;;  %796 = vrot.lane.b32.xlu1 %v777_v44, %s1004_s17  ;;  %v776_v53 = vmin.f32 %v768_v45, 2.0  ;;  %v771_v54 = vmax.f32 %v744_v46, -20.0 }
 0x4d5   :  { %v962_v51 = vpop.f32.mrf.mxu1 }
 0x4d6   :  { %762 = vst.msk [vmem:[%s1376_s11 + $0x20] sm:$0xff] %vm757_vm2, %v739_v50  ;;  %v770_v58 = vmax.f32 %v739_v50, -20.0  ;;  %v754_v59 = vadd.f32 %v962_v51, %v852_v19  ;;  %v779_v63 = vmin.f32 %v771_v54, 2.0 }
 0x4d7   :  { %v748_v60 = vpop.f32.mrf.mxu1 }
 0x4d8   :  { %v778_v62 = vmin.f32 %v770_v58, 2.0  ;;  %765 = vst.msk [vmem:[%s1376_s11 + $0x38] sm:$0xff] %vm757_vm2, %v754_v59  ;;  %v749_v41 = vadd.f32 %v852_v19, %v748_v60  ;;  %794 = vrot.lane.b32.xlu1 %v776_v53, %s1004_s17  ;;  %v773_v0 = vmax.f32 %v754_v59, -20.0 }
 0x4da   :  { %764 = vst.msk [vmem:[%s1376_s11 + $0x30] sm:$0xff] %vm757_vm2, %v749_v41  ;;  %v772_v4 = vmax.f32 %v749_v41, -20.0  ;;  %798 = vrot.lane.b32.xlu0 %v778_v62, %s1004_s17  ;;  %v781_v6 = vmin.f32 %v773_v0, 2.0 }
 0x4dc   :  { %v780_v5 = vmin.f32 %v772_v4, 2.0  ;;  %800 = vrot.lane.b32.xlu1 %v779_v63, %s1004_s17 }
 0x4de   :  { %802 = vrot.lane.b32.xlu0 %v780_v5, %s1004_s17 }
 0x4e0   :  { %804 = vrot.lane.b32.xlu1 %v781_v6, %s1004_s17 }
 0x542   :  { %v793_v48 = vpop.permute.xlu1 %792 }
 0x543   :  { %815 = vst.msk [vmem:[%s1377_s12 + $0x8] sm:$0xff] %vm757_vm2, %v793_v48 }
 0x544   :  { %v791_v8 = vpop.permute.xlu0 %790 }
 0x545   :  { %814 = vst.msk [vmem:[%s1377_s12] sm:$0xff] %vm757_vm2, %v791_v8 }
 0x546   :  { %v797_v47 = vpop.permute.xlu1 %796 }
 0x547   :  { %817 = vst.msk [vmem:[%s1377_s12 + $0x18] sm:$0xff] %vm757_vm2, %v797_v47 }
 0x54a   :  { %v795_v9 = vpop.permute.xlu1 %794 }
 0x54b   :  { %816 = vst.msk [vmem:[%s1377_s12 + $0x10] sm:$0xff] %vm757_vm2, %v795_v9 }
 0x54c   :  { %v799_v52 = vpop.permute.xlu0 %798 }
 0x54d   :  { %818 = vst.msk [vmem:[%s1377_s12 + $0x20] sm:$0xff] %vm757_vm2, %v799_v52 }
 0x54e   :  { %v801_v11 = vpop.permute.xlu1 %800 }
 0x54f   :  { %819 = vst.msk [vmem:[%s1377_s12 + $0x28] sm:$0xff] %vm757_vm2, %v801_v11 }
 0x550   :  { %v803_v56 = vpop.permute.xlu0 %802 }
 0x551   :  { %820 = vst.msk [vmem:[%s1377_s12 + $0x30] sm:$0xff] %vm757_vm2, %v803_v56 }
 0x552   :  { %v805_v13 = vpop.permute.xlu1 %804 }
 0x553   :  { %821 = vst.msk [vmem:[%s1377_s12 + $0x38] sm:$0xff] %vm757_vm2, %v805_v13 }

</bundles_post_ra>
